<compile_context>
chip_gen: v5e
topology: v5e:2x2
jax: 0.10.0
libtpu: 0.0.40
codegen_flags: <defaults>
</compile_context>

<pallas_src>
import math
import functools

import jax
import jax.numpy as jnp
from jax import lax
from jax.experimental import pallas as pl
from jax.experimental.pallas import tpu as pltpu

MAX_LEN = 18        # int(config['data']['max_len']) + 2  -> synthetic: max_len=16 gives 18
D_MODEL = 32
DROPOUT_P = 0.1


def make_pe_table(max_len: int, d_model: int) -> jnp.ndarray:
    """Deterministic sinusoidal table, identical to the PyTorch buffer (squeezed)."""
    position = jnp.arange(max_len, dtype=jnp.float32)[:, None]               # [L, 1]
    div_term = jnp.exp(jnp.arange(0, d_model, 2, dtype=jnp.float32)
                       * (-math.log(10000.0) / d_model))                     # [D/2]
    pe = jnp.zeros((max_len, d_model), dtype=jnp.float32)
    pe = pe.at[:, 0::2].set(jnp.sin(position * div_term))
    pe = pe.at[:, 1::2].set(jnp.cos(position * div_term))
    return pe


# ---------------- Pallas kernels ----------------

def _pe_add_kernel(x_ref, pe_ref, o_ref):
    # x: [tb, S*D], pe: [1, S*D] -> sublane-broadcast add over the row tile.
    o_ref[...] = (x_ref[...] + pe_ref[...]).astype(o_ref.dtype)


def _pe_add_dropout_kernel(x_ref, pe_ref, bits_ref, o_ref, *, threshold, scale):
    # Inverted dropout: keep iff (sign-flipped) uniform int32 bits >= threshold.
    y = x_ref[...] + pe_ref[...]
    keep = bits_ref[...] >= jnp.int32(threshold)
    o_ref[...] = (jnp.where(keep, y, 0.0) * scale).astype(o_ref.dtype)


# ---------------- wrapper ----------------

def _row_tile(rows: int, cols: int, itemsize: int, tile_bytes: int = 1 << 20) -> int:
    """Row tile: full `rows` if it fits ~tile_bytes per buffer, else a multiple of 8."""
    if rows * cols * itemsize <= tile_bytes:
        return rows
    tb = (tile_bytes // (cols * itemsize)) & ~7   # round down to multiple of 8
    tb = max(tb, 8)
    return min(tb, rows)


def positional_encoding(x, pe_table, *, p=DROPOUT_P, training=False, dropout_key=None):
    """x: [batch, seq_len, d_model] (batch_first=True). Returns dropout(x + pe[:seq_len])."""
    B, S, D = x.shape
    cols = S * D
    x2 = x.reshape(B, cols)                                   # lane-dense view
    pe2 = pe_table[:S].astype(x.dtype).reshape(1, cols)       # [1, S*D]

    tb = _row_tile(B, cols, x2.dtype.itemsize)
    grid = (pl.cdiv(B, tb),)

    compiler_params = None
    if jax.default_backend() == "tpu":
        compiler_params = pltpu.CompilerParams(
            dimension_semantics=("parallel",),
            vmem_limit_bytes=32 * 1024 * 1024,
        )

    x_spec = pl.BlockSpec((tb, cols), lambda i: (i, 0))
    pe_spec = pl.BlockSpec((1, cols), lambda i: (0, 0))       # resident across all grid steps
    out_spec = pl.BlockSpec((tb, cols), lambda i: (i, 0))
    out_shape = jax.ShapeDtypeStruct((B, cols), x.dtype)

    if (not training) or p == 0.0:
        # Dropout is identity in eval mode (nn.Dropout semantics).
        out2 = pl.pallas_call(
            _pe_add_kernel,
            out_shape=out_shape,
            grid=grid,
            in_specs=[x_spec, pe_spec],
            out_specs=out_spec,
            compiler_params=compiler_params,
        )(x2, pe2)
    else:
        if dropout_key is None:
            dropout_key = jax.random.PRNGKey(0)
        # Uniform uint32 bits; XOR the sign bit so u32 ordering is preserved under the
        # signed int32 compare inside the kernel.
        bits_u32 = jax.random.bits(dropout_key, (B, cols), dtype=jnp.uint32)
        bits_i32 = lax.bitcast_convert_type(bits_u32 ^ jnp.uint32(0x80000000), jnp.int32)
        threshold = int(round(p * 2.0 ** 32)) - 2 ** 31       # keep iff u32 >= p * 2^32
        scale = 1.0 / (1.0 - p)
        out2 = pl.pallas_call(
            functools.partial(_pe_add_dropout_kernel, threshold=threshold, scale=scale),
            out_shape=out_shape,
            grid=grid,
            in_specs=[x_spec, pe_spec, x_spec],                # bits tile exactly like x
            out_specs=out_spec,
            compiler_params=compiler_params,
        )(x2, pe2, bits_i32)

    return out2.reshape(B, S, D)


if __name__ == "__main__":
    key = jax.random.PRNGKey(0)
    key_x, key_drop = jax.random.split(key)
    batch, seq_len, d_model = 2, 8, D_MODEL
    x = jax.random.normal(key_x, (batch, seq_len, d_model), dtype=jnp.float32)

    pe_table = make_pe_table(MAX_LEN, d_model)
    ref = x + pe_table[:seq_len][None, :, :]

    # Eval mode (dropout = identity): exact check against the reference math.
    out_eval = positional_encoding(x, pe_table, training=False)
    jax.block_until_ready(out_eval)
    assert out_eval.shape == (batch, seq_len, d_model)
    assert jnp.allclose(out_eval, ref, atol=1e-6), "eval-mode mismatch"

    # Training mode: every element is either 0 (dropped) or (x+pe)/(1-p) (kept),
    # with roughly (1-p) of elements surviving.
    out_train = positional_encoding(x, pe_table, training=True, dropout_key=key_drop)
    jax.block_until_ready(out_train)
    assert out_train.shape == (batch, seq_len, d_model)
    scaled = ref / (1.0 - DROPOUT_P)
    is_drop = jnp.abs(out_train) <= 1e-6
    is_keep = jnp.abs(out_train - scaled) <= 1e-4 * (1.0 + jnp.abs(scaled))
    assert bool(jnp.all(is_drop | is_keep)), "train-mode element mismatch"
    drop_frac = float(jnp.mean(is_drop.astype(jnp.float32)))
    assert 0.0 < drop_frac < 0.35, f"unexpected drop fraction {drop_frac}"

    print("KERNEL_OK")
</pallas_src>

<mosaic_0001>
module attributes {stable_mosaic.version = 11 : i64} {
  func.func @_pe_add_kernel(%arg0: i32, %arg1: memref<2x256xf32, #tpu.memory_space<vmem>>, %arg2: memref<1x256xf32, #tpu.memory_space<vmem>>, %arg3: memref<2x256xf32, #tpu.memory_space<vmem>>) attributes {dimension_semantics = [#tpu.dimension_semantics<arbitrary>], iteration_bounds = array<i64: 1>, scalar_prefetch = 0 : i64, scratch_operands = 0 : i64, tpu.core_type = #tpu.core_type<tc>, window_params = [{transform_indices = @transform_0, window_bounds = array<i64: 2, 256>}, {pipeline_mode = #tpu.pipeline_mode<synchronous>, transform_indices = @transform_1, window_bounds = array<i64: 1, 256>}, {transform_indices = @transform_2, window_bounds = array<i64: 2, 256>}]} {
    %c0 = arith.constant 0 : index
    %c0_0 = arith.constant 0 : index
    %0 = vector.load %arg1[%c0, %c0_0] : memref<2x256xf32, #tpu.memory_space<vmem>>, vector<2x256xf32>
    %c0_1 = arith.constant 0 : index
    %c0_2 = arith.constant 0 : index
    %1 = vector.load %arg2[%c0_1, %c0_2] : memref<1x256xf32, #tpu.memory_space<vmem>>, vector<1x256xf32>
    %2 = vector.broadcast %1 : vector<1x256xf32> to vector<2x256xf32>
    %3 = arith.addf %0, %2 : vector<2x256xf32>
    %c0_3 = arith.constant 0 : index
    %c0_4 = arith.constant 0 : index
    %4 = vector.load %arg3[%c0_3, %c0_4] : memref<2x256xf32, #tpu.memory_space<vmem>>, vector<2x256xf32>
    tpu.vector_store %arg3[%c0_3, %c0_4], %3 {strides = array<i32>} : memref<2x256xf32, #tpu.memory_space<vmem>>, vector<2x256xf32>,
    return
  }
  func.func @transform_0(%arg0: i32) -> (i32, i32) {
    %c0_i32 = arith.constant 0 : i32
    %c0_i32_0 = arith.constant 0 : i32
    return %arg0, %c0_i32 : i32, i32
  }
  func.func @transform_1(%arg0: i32) -> (i32, i32) {
    %c0_i32 = arith.constant 0 : i32
    %c0_i32_0 = arith.constant 0 : i32
    %c0_i32_1 = arith.constant 0 : i32
    return %c0_i32, %c0_i32_0 : i32, i32
  }
  func.func @transform_2(%arg0: i32) -> (i32, i32) {
    %c0_i32 = arith.constant 0 : i32
    %c0_i32_0 = arith.constant 0 : i32
    return %arg0, %c0_i32 : i32, i32
  }
}

</mosaic_0001>

<bundles_post_ra>
// kernel: tpu_custom_call.1
= control target key start
LH: loop header
LB: loop body
LE: loop exit
PB: predicated region body
PF: predicated region fallthrough
CT: control target
= control target key end

     0   :  { %7 = vsyncpa [#allocation3], 0  ;;  %s177_s0 = inlined_call_operand.hbm [shape: f32[2,256], index: 0, kind: input, shape index: {}]   ;;  %s178_s1 = inlined_call_operand.hbm [shape: f32[1,256], index: 1, kind: input, shape index: {}]   ;;  %s179_s2 = inlined_call_operand.hbm [shape: f32[2,256], index: 2, kind: output, shape index: {}]  }
   0x1   :  { %8 = vsyncpa [#allocation6], 0 }
   0x2   :  { %9 = vsyncpa [#allocation4], 0  ;;  %s15_s11 = sshll.u32 %s177_s0, 4  ;;  %s150_s12 = smov [#allocation2]   ;;  %s16_s11 = int_to_ptr.hbm [resolvable:$true] %s15_s11 }
   0x3   :  { %s17_s13 = sshll.u32 %s150_s12, 4  ;;  %s26_s16 = sshll.u32 %s178_s1, 4  ;;  %s18_s13 = int_to_ptr.vmem [resolvable:$true] %s17_s13  ;;  %s27_s16 = int_to_ptr.hbm [resolvable:$true] %s26_s16 }
   0x4   :  { %20 = dma.hbm_to_vmem [thread:$0]  %s16_s11, 64, %s18_s13, [#allocation3]  }
   0x5   :  { %s151_s17 = smov [#allocation5]  }
   0x6   :  { %s28_s18 = sshll.u32 %s151_s17, 4  ;;  %s29_s18 = int_to_ptr.vmem [resolvable:$true] %s28_s18 }
   0x7   :  { %31 = dma.hbm_to_vmem [thread:$0]  %s27_s16, 32, %s29_s18, [#allocation6]  }
   0x8   :  { %144 = dma.done.wait [#allocation3], 64  }
   0x9   :  { %145 = vsyncadd [#allocation3], 4294967232 }
   0xa   :  { %146 = dma.done.wait [#allocation6], 32  }
   0xb   :  { %147 = vsyncadd [#allocation6], 4294967264  ;;  %v41_v0 = vld [vmem:[#allocation5] sm:$0x3]  ;;  %vm46_vm0 = vcmask 1041408   ;;  %s152_s0 = smov [#allocation7]  }
   0xc   :  { %v43_v1 = vperm.slane %v41_v0, 0  ;;  %v44_v2 = vperm.slane %v41_v0, 1  ;;  %v40_v3 = vld [vmem:[#allocation2] sm:$0xf]  ;;  %s56_s19 = sshll.u32 %s152_s0, 4  ;;  %s58_s21 = sshll.u32 %s179_s2, 4  ;;  %s57_s19 = int_to_ptr.vmem [resolvable:$true] %s56_s19  ;;  %s59_s21 = int_to_ptr.hbm [resolvable:$true] %s58_s21 }
   0xe   :  { %v45_v4 = vrot.slane %v44_v2, 6 }
  0x10   :  { %v47_v5 = vsel %vm46_vm0, %v43_v1, %v45_v4 }
  0x11   :  { %v49_v6 = vadd.f32 %v47_v5, %v40_v3 }
  0x13   :  { %50 = vst [vmem:[#allocation7] sm:$0xf] %v49_v6 }
  0x14   :  { %61 = dma.vmem_to_hbm [thread:$0]  %s57_s19, 64, %s59_s21, [#allocation4]  }
  0x15   :  { %148 = dma.done.wait [#allocation4], 64  }
  0x16   :  { %149 = vsyncadd [#allocation4], 4294967232 }
  0x17   :  { %66 = vsyncpa [#allocation3], 1 }
  0x18   :  { %67 = vsyncpa [#allocation6], 1 }
  0x19   :  { %68 = vsyncpa [#allocation4], 1 }

</bundles_post_ra>
